<compile_context>
chip_gen: v5e
topology: v5e:2x2
jax: 0.10.0
libtpu: 0.0.40
codegen_flags: <defaults>
</compile_context>

<pallas_src>
from functools import partial

import jax
import jax.numpy as jnp
from jax.experimental import pallas as pl
from jax.experimental.pallas import tpu as pltpu


def _round_up(x, m):
    return (x + m - 1) // m * m


def _pick_div(n, cands):
    for c in cands:
        if n % c == 0:
            return c
    return n


# ----------------------------------------------------------------------------
# Pallas kernels
# ----------------------------------------------------------------------------
def _make_matmul_kernel(act, has_res):
    """bf16 x bf16 -> f32 MXU matmul, accumulated straight into o_ref, with a
    fused bias (+ residual) + activation epilogue at the last K step."""

    def kernel(x_ref, w_ref, b_ref, *rest):
        if has_res:
            r_ref, o_ref = rest
        else:
            (o_ref,) = rest

        @pl.when(pl.program_id(2) == 0)
        def _():
            o_ref[...] = jnp.zeros_like(o_ref)

        o_ref[...] += jnp.dot(
            x_ref[...], w_ref[...], preferred_element_type=jnp.float32
        )

        @pl.when(pl.program_id(2) == pl.num_programs(2) - 1)
        def _():
            y = o_ref[...] + b_ref[...]
            if has_res:
                y = y + r_ref[...]
            if act == "relu":
                y = jnp.maximum(y, 0.0)
            elif act == "tanh":
                y = jnp.tanh(y)
            o_ref[...] = y

    return kernel


def _pad_cast_2d(x, mp, kp, dtype):
    x = x.astype(dtype)
    m, k = x.shape
    if m != mp or k != kp:
        x = jnp.pad(x, ((0, mp - m), (0, kp - k)))
    return x


def _gemm(x, w, b, residual, act, n_out):
    """y = act(x @ w + b [+ residual])[:M, :n_out].

    x: (M, K) float; w: (Kp, Np) bf16 pre-padded GEMM weight; b: (1, Np) f32;
    residual: optional (M, n_out) f32.  Output f32.
    """
    M, K = x.shape
    Kp, Np = w.shape
    Mp = _round_up(M, 8)
    if Mp >= 128:
        Mp = _round_up(Mp, 128)
        tm = 256 if Mp % 256 == 0 else 128
    else:
        tm = Mp
    tk = _pick_div(Kp, (512, 384, 256, 128))
    tn = _pick_div(Np, (256, 128))  # cap at 256: safe for v5e single vst slot

    xb = _pad_cast_2d(x, Mp, Kp, jnp.bfloat16)

    in_specs = [
        pl.BlockSpec((tm, tk), lambda i, j, k: (i, k)),
        pl.BlockSpec((tk, tn), lambda i, j, k: (k, j)),
        pl.BlockSpec((1, tn), lambda i, j, k: (0, j)),
    ]
    args = [xb, w, b]
    has_res = residual is not None
    if has_res:
        rp = _pad_cast_2d(residual, Mp, Np, jnp.float32)
        in_specs.append(pl.BlockSpec((tm, tn), lambda i, j, k: (i, j)))
        args.append(rp)

    out = pl.pallas_call(
        _make_matmul_kernel(act, has_res),
        out_shape=jax.ShapeDtypeStruct((Mp, Np), jnp.float32),
        grid_spec=pltpu.PrefetchScalarGridSpec(
            num_scalar_prefetch=0,
            grid=(Mp // tm, Np // tn, Kp // tk),
            in_specs=in_specs,
            out_specs=pl.BlockSpec((tm, tn), lambda i, j, k: (i, j)),
        ),
        compiler_params=pltpu.CompilerParams(
            dimension_semantics=("parallel", "parallel", "arbitrary")
        ),
    )(*args)
    if Mp != M or Np != n_out:
        out = out[:M, :n_out]
    return out


def _maxpool_kernel(p_ref, o_ref):
    o_ref[...] = jnp.max(p_ref[...], axis=0)


@jax.jit
def maxpool2d_3x3_s2_p1(x):
    """MaxPool2d(kernel=3, stride=2, padding=1) in NHWC, blocked over rows."""
    N, H, W, C = x.shape
    Ho = (H + 2 - 3) // 2 + 1
    Wo = (W + 2 - 3) // 2 + 1
    neg = float("-inf")
    xp = jnp.pad(x, ((0, 0), (1, 1), (1, 1), (0, 0)), constant_values=neg)
    pats = [
        xp[:, ki : ki + 2 * Ho : 2, kj : kj + 2 * Wo : 2, :]
        for ki in range(3)
        for kj in range(3)
    ]
    M = N * Ho * Wo
    p = jnp.stack(pats, axis=0).reshape(9, M, C)
    Mp = _round_up(M, 8)
    if Mp != M:
        p = jnp.pad(p, ((0, 0), (0, Mp - M), (0, 0)), constant_values=neg)
    tm = _pick_div(Mp, (512, 256, 128)) if Mp >= 128 else Mp
    out = pl.pallas_call(
        _maxpool_kernel,
        out_shape=jax.ShapeDtypeStruct((Mp, C), jnp.float32),
        grid_spec=pltpu.PrefetchScalarGridSpec(
            num_scalar_prefetch=0,
            grid=(Mp // tm,),
            in_specs=[pl.BlockSpec((9, tm, C), lambda i: (0, i, 0))],
            out_specs=pl.BlockSpec((tm, C), lambda i: (i, 0)),
        ),
        compiler_params=pltpu.CompilerParams(dimension_semantics=("parallel",)),
    )(p)
    return out[:M].reshape(N, Ho, Wo, C)


# ----------------------------------------------------------------------------
# Conv2d (+ folded BatchNorm + activation + optional fused residual) wrappers
# ----------------------------------------------------------------------------
@partial(jax.jit, static_argnames=("kh", "kw", "stride", "pad", "act", "cout"))
def conv_bn_act(x, w, b, residual, *, kh, kw, stride, pad, act, cout):
    """x: (N,H,W,C) NHWC f32.  w: (Kp, Np) bf16 GEMM-ready (BN scale folded),
    b: (1, Np) f32 (BN shift).  residual (optional): (N,Ho,Wo,cout) f32."""
    N, H, W, C = x.shape
    Ho = (H + 2 * pad - kh) // stride + 1
    Wo = (W + 2 * pad - kw) // stride + 1
    xb = x.astype(jnp.bfloat16)
    if pad:
        xb = jnp.pad(xb, ((0, 0), (pad, pad), (pad, pad), (0, 0)))
    if kh == 1 and kw == 1 and stride == 1:
        patches = xb.reshape(N * H * W, C)
    else:
        # TODO(synk): fold the (kh,kw) taps into the GEMM K grid axis with
        # pl.Element index maps so 3x3 im2col patches are never materialized.
        pats = [
            xb[:, ki : ki + stride * Ho : stride, kj : kj + stride * Wo : stride, :]
            for ki in range(kh)
            for kj in range(kw)
        ]
        patches = jnp.concatenate(pats, axis=-1).reshape(N * Ho * Wo, kh * kw * C)
    res2d = None
    if residual is not None:
        res2d = residual.reshape(N * Ho * Wo, cout)
    y = _gemm(patches, w, b, res2d, act, cout)
    return y.reshape(N, Ho, Wo, cout)


@partial(jax.jit, static_argnames=("act", "n_out"))
def linear_act(x, w, b, *, act, n_out):
    return _gemm(x, w, b, None, act, n_out)


def conv_call(x, cw, *, stride, pad, act, residual=None):
    return conv_bn_act(
        x, cw["w"], cw["b"], residual,
        kh=cw["kh"], kw=cw["kw"], stride=stride, pad=pad, act=act, cout=cw["cout"],
    )


# ----------------------------------------------------------------------------
# Deterministic parameter init (synthetic weights, ResNet-101 shapes),
# pre-packed into GEMM-ready bf16 form.
# ----------------------------------------------------------------------------
class KeyGen:
    def __init__(self, seed):
        self.key = jax.random.PRNGKey(seed)
        self.i = 0

    def __call__(self):
        self.i += 1
        return jax.random.fold_in(self.key, self.i)


def conv_init(kg, out_ch, in_ch, kh, kw):
    fan_in = in_ch * kh * kw
    std = (2.0 / fan_in) ** 0.5
    return std * jax.random.normal(kg(), (out_ch, in_ch, kh, kw), jnp.float32)


def bn_init(kg, ch, eps=1e-5):
    gamma = 1.0 + 0.1 * jax.random.normal(kg(), (ch,), jnp.float32)
    beta = 0.1 * jax.random.normal(kg(), (ch,), jnp.float32)
    mean = 0.1 * jax.random.normal(kg(), (ch,), jnp.float32)
    var = jnp.abs(1.0 + 0.1 * jax.random.normal(kg(), (ch,), jnp.float32))
    scale = gamma / jnp.sqrt(var + eps)  # folded eval-mode BatchNorm
    shift = beta - mean * scale
    return (scale, shift)


def linear_init(kg, out_f, in_f):
    std = (1.0 / in_f) ** 0.5
    w = std * jax.random.normal(kg(), (out_f, in_f), jnp.float32)
    b = std * jax.random.normal(kg(), (out_f,), jnp.float32)
    return w, b


def pack_conv(w_oihw, bn):
    """OIHW conv weight + folded BN -> pre-padded bf16 GEMM weight (Kp, Np)."""
    scale, shift = bn
    O, I, kh, kw = w_oihw.shape
    wm = jnp.transpose(w_oihw, (2, 3, 1, 0)).reshape(kh * kw * I, O)
    wm = wm * scale[None, :]  # fold BN scale into weight columns (f32)
    K = kh * kw * I
    Kp, Np = _round_up(K, 128), _round_up(O, 128)
    wp = jnp.zeros((Kp, Np), jnp.bfloat16).at[:K, :O].set(wm.astype(jnp.bfloat16))
    bp = jnp.zeros((1, Np), jnp.float32).at[0, :O].set(shift)
    return {"w": wp, "b": bp, "kh": int(kh), "kw": int(kw), "cout": int(O)}


def pack_linear(w, bias):
    out_f, in_f = w.shape
    Kp, Np = _round_up(in_f, 128), _round_up(out_f, 128)
    wp = jnp.zeros((Kp, Np), jnp.bfloat16).at[:in_f, :out_f].set(
        w.T.astype(jnp.bfloat16)
    )
    bp = jnp.zeros((1, Np), jnp.float32).at[0, :out_f].set(bias)
    return {"w": wp, "b": bp, "nout": int(out_f)}


def init_bottleneck(kg, inplanes, planes, stride, downsample):
    p = {
        "conv1": pack_conv(conv_init(kg, planes, inplanes, 1, 1), bn_init(kg, planes)),
        "conv2": pack_conv(conv_init(kg, planes, planes, 3, 3), bn_init(kg, planes)),
        "conv3": pack_conv(conv_init(kg, planes * 4, planes, 1, 1),
                           bn_init(kg, planes * 4)),
        "stride": stride,
    }
    if downsample:
        p["down"] = pack_conv(conv_init(kg, planes * 4, inplanes, 1, 1),
                              bn_init(kg, planes * 4))
    return p


def init_resnet101_autoencoder(seed=0):
    kg = KeyGen(seed)
    P = {"stem": pack_conv(conv_init(kg, 64, 3, 7, 7), bn_init(kg, 64))}
    layers_cfg = [(64, 3, 1), (128, 4, 2), (256, 23, 2), (512, 3, 2)]  # resnet101
    inplanes = 64
    P["layers"] = []
    for planes, blocks, stride in layers_cfg:
        layer = [init_bottleneck(kg, inplanes, planes, stride, True)]
        inplanes = planes * 4
        for _ in range(blocks - 1):
            layer.append(init_bottleneck(kg, inplanes, planes, 1, False))
        P["layers"].append(layer)
    P["fc"] = pack_linear(*linear_init(kg, 100, 2048))
    P["dec1"] = pack_linear(*linear_init(kg, 512, 100))
    P["dec2"] = pack_linear(*linear_init(kg, 2048, 512))
    P["dec3"] = pack_linear(*linear_init(kg, 64 * 64 * 3, 2048))
    return P


# ----------------------------------------------------------------------------
# Forward pass
# ----------------------------------------------------------------------------
def bottleneck_fwd(x, p):
    identity = x
    out = conv_call(x, p["conv1"], stride=1, pad=0, act="relu")
    out = conv_call(out, p["conv2"], stride=p["stride"], pad=1, act="relu")
    if "down" in p:
        identity = conv_call(x, p["down"], stride=p["stride"], pad=0, act="none")
    # conv3 + BN3 with residual add and final ReLU fused into the GEMM epilogue.
    out = conv_call(out, p["conv3"], stride=1, pad=0, act="relu", residual=identity)
    return out


def forward(P, x_nchw):
    B = x_nchw.shape[0]
    # NCHW (PyTorch) -> NHWC (kernel layout: channels on the 128-wide lane dim)
    x = jnp.transpose(x_nchw, (0, 2, 3, 1)).astype(jnp.float32)

    # ---- encoder: resnet101 ----
    x = conv_call(x, P["stem"], stride=2, pad=3, act="relu")
    x = maxpool2d_3x3_s2_p1(x)
    for layer in P["layers"]:
        for blk in layer:
            x = bottleneck_fwd(x, blk)
    # adaptive avg pool to 1x1: tiny spatial mean, kept as JAX glue
    feat = jnp.mean(x, axis=(1, 2))  # (B, 2048)
    feat = linear_act(feat, P["fc"]["w"], P["fc"]["b"], act="none",
                      n_out=P["fc"]["nout"])  # (B, 100)

    # ---- decoder ----
    h = linear_act(feat, P["dec1"]["w"], P["dec1"]["b"], act="relu",
                   n_out=P["dec1"]["nout"])
    h = linear_act(h, P["dec2"]["w"], P["dec2"]["b"], act="relu",
                   n_out=P["dec2"]["nout"])
    h = linear_act(h, P["dec3"]["w"], P["dec3"]["b"], act="tanh",
                   n_out=P["dec3"]["nout"])  # (B, 12288)

    # x.view(B, 3, 64, 64)
    return h.reshape(B, 3, 64, 64)


if __name__ == "__main__":
    params = init_resnet101_autoencoder(seed=0)
    x = jax.random.normal(jax.random.PRNGKey(0), (2, 3, 64, 64), jnp.float32)
    y = forward(params, x)
    y = jax.block_until_ready(y)
    assert y.shape == (2, 3, 64, 64), y.shape
    assert bool(jnp.all(jnp.isfinite(y)))
    assert bool(jnp.all(jnp.abs(y) <= 1.0 + 1e-6))  # tanh output range
    print("KERNEL_OK")
</pallas_src>

<mosaic_0001>
module attributes {stable_mosaic.version = 11 : i64} {
  func.func @kernel(%arg0: i32, %arg1: i32, %arg2: i32, %arg3: memref<256x256xbf16, #tpu.memory_space<vmem>>, %arg4: memref<256x128xbf16, #tpu.memory_space<vmem>>, %arg5: memref<1x128xf32, #tpu.memory_space<vmem>>, %arg6: memref<256x128xf32, #tpu.memory_space<vmem>>) attributes {dimension_semantics = [#tpu.dimension_semantics<parallel>, #tpu.dimension_semantics<parallel>, #tpu.dimension_semantics<arbitrary>], iteration_bounds = array<i64: 8, 1, 1>, scalar_prefetch = 0 : i64, scratch_operands = 0 : i64, tpu.core_type = #tpu.core_type<tc>, window_params = [{transform_indices = @transform_0, window_bounds = array<i64: 256, 256>}, {transform_indices = @transform_1, window_bounds = array<i64: 256, 128>}, {transform_indices = @transform_2, window_bounds = array<i64: 1, 128>}, {transform_indices = @transform_3, window_bounds = array<i64: 256, 128>}]} {
    %c0_i32 = arith.constant 0 : i32
    %0 = arith.cmpi eq, %arg2, %c0_i32 : i32
    %1 = arith.extui %0 : i1 to i32
    %c0_i32_0 = arith.constant 0 : i32
    %2 = arith.cmpi ne, %1, %c0_i32_0 : i32
    scf.if %2 {
      %cst_10 = arith.constant 0.000000e+00 : f32
      %12 = vector.broadcast %cst_10 : f32 to vector<256x128xf32>
      %c0_11 = arith.constant 0 : index
      %c0_12 = arith.constant 0 : index
      %13 = vector.load %arg6[%c0_11, %c0_12] : memref<256x128xf32, #tpu.memory_space<vmem>>, vector<256x128xf32>
      tpu.vector_store %arg6[%c0_11, %c0_12], %12 {strides = array<i32>} : memref<256x128xf32, #tpu.memory_space<vmem>>, vector<256x128xf32>,
    } else {
    }
    %c0 = arith.constant 0 : index
    %c0_1 = arith.constant 0 : index
    %3 = vector.load %arg6[%c0, %c0_1] : memref<256x128xf32, #tpu.memory_space<vmem>>, vector<256x128xf32>
    %c0_2 = arith.constant 0 : index
    %c0_3 = arith.constant 0 : index
    %4 = vector.load %arg3[%c0_2, %c0_3] : memref<256x256xbf16, #tpu.memory_space<vmem>>, vector<256x256xbf16>
    %c0_4 = arith.constant 0 : index
    %c0_5 = arith.constant 0 : index
    %5 = vector.load %arg4[%c0_4, %c0_5] : memref<256x128xbf16, #tpu.memory_space<vmem>>, vector<256x128xbf16>
    %cst = arith.constant dense<0.000000e+00> : vector<256x128xf32>
    %6 = tpu.matmul %4, %5, %cst {dimension_numbers = #tpu.dot_dimension_numbers<[1], [0], [0], [1], [0, 0, 1, 1], [], []>} : vector<256x256xbf16>, vector<256x128xbf16>, vector<256x128xf32> -> vector<256x128xf32>
    %7 = arith.addf %3, %6 : vector<256x128xf32>
    %c0_6 = arith.constant 0 : index
    %c0_7 = arith.constant 0 : index
    %8 = vector.load %arg6[%c0_6, %c0_7] : memref<256x128xf32, #tpu.memory_space<vmem>>, vector<256x128xf32>
    tpu.vector_store %arg6[%c0_6, %c0_7], %7 {strides = array<i32>} : memref<256x128xf32, #tpu.memory_space<vmem>>, vector<256x128xf32>,
    %c0_i32_8 = arith.constant 0 : i32
    %9 = arith.cmpi eq, %arg2, %c0_i32_8 : i32
    %10 = arith.extui %9 : i1 to i32
    %c0_i32_9 = arith.constant 0 : i32
    %11 = arith.cmpi ne, %10, %c0_i32_9 : i32
    scf.if %11 {
      %c0_10 = arith.constant 0 : index
      %c0_11 = arith.constant 0 : index
      %12 = vector.load %arg6[%c0_10, %c0_11] : memref<256x128xf32, #tpu.memory_space<vmem>>, vector<256x128xf32>
      %c0_12 = arith.constant 0 : index
      %c0_13 = arith.constant 0 : index
      %13 = vector.load %arg5[%c0_12, %c0_13] : memref<1x128xf32, #tpu.memory_space<vmem>>, vector<1x128xf32>
      %14 = vector.broadcast %13 : vector<1x128xf32> to vector<256x128xf32>
      %15 = arith.addf %12, %14 : vector<256x128xf32>
      %cst_14 = arith.constant 0.000000e+00 : f32
      %16 = vector.broadcast %cst_14 : f32 to vector<256x128xf32>
      %17 = arith.maximumf %15, %16 : vector<256x128xf32>
      %c0_15 = arith.constant 0 : index
      %c0_16 = arith.constant 0 : index
      %18 = vector.load %arg6[%c0_15, %c0_16] : memref<256x128xf32, #tpu.memory_space<vmem>>, vector<256x128xf32>
      tpu.vector_store %arg6[%c0_15, %c0_16], %17 {strides = array<i32>} : memref<256x128xf32, #tpu.memory_space<vmem>>, vector<256x128xf32>,
    } else {
    }
    return
  }
  func.func @transform_0(%arg0: i32, %arg1: i32, %arg2: i32) -> (i32, i32) {
    %c0_i32 = arith.constant 0 : i32
    return %arg0, %arg2 : i32, i32
  }
  func.func @transform_1(%arg0: i32, %arg1: i32, %arg2: i32) -> (i32, i32) {
    %c0_i32 = arith.constant 0 : i32
    return %arg2, %arg1 : i32, i32
  }
  func.func @transform_2(%arg0: i32, %arg1: i32, %arg2: i32) -> (i32, i32) {
    %c0_i32 = arith.constant 0 : i32
    %c0_i32_0 = arith.constant 0 : i32
    return %c0_i32, %arg1 : i32, i32
  }
  func.func @transform_3(%arg0: i32, %arg1: i32, %arg2: i32) -> (i32, i32) {
    %c0_i32 = arith.constant 0 : i32
    return %arg0, %arg1 : i32, i32
  }
}

</mosaic_0001>

<bundles_post_ra>
// kernel: conv_bn_act.1
= control target key start
LH: loop header
LB: loop body
LE: loop exit
PB: predicated region body
PF: predicated region fallthrough
CT: control target
= control target key end

     0   :  { %8 = vsyncpa [#allocation3], 0  ;;  %s1873_s0 = inlined_call_operand.vmem [shape: bf16[2048,256], index: 0, kind: input, shape index: {}]   ;;  %s1874_s1 = inlined_call_operand.vmem [shape: bf16[256,128], index: 1, kind: input, shape index: {}]   ;;  %s1875_s2 = inlined_call_operand.vmem [shape: f32[1,128], index: 2, kind: input, shape index: {}]   ;;  %s1876_s3 = inlined_call_operand.hbm [shape: f32[2048,128], index: 3, kind: output, shape index: {}]  }
   0x1   :  { %10 = vsyncpa [#allocation3 + $0x1], 0  ;;  %s1587_s12 = smov 0   ;;  %s1589_s13 = smov 0  }
   0x2   :  { %s1591_s14 = smov 0   ;;  %s1593_s15 = smov 0  }
   0x3   :  { %s1595_s16 = smov 0   ;;  %s1597_s17 = smov 0  }
   0x4 LB: > { %s1152_s18 = sadd.s32 4294967295, %s1563_s17   ;;  %s1153_s19 = sadd.s32 4294967294, %s1563_s17   ;;  %s1563_s17 = sphi %s1597_s17, %s16_s17   ;;  %s1559_s16 = sphi %s1595_s16, %s1883_s16   ;;  %s1555_s15 = sphi %s1593_s15, %s1882_s15   ;;  %s1551_s14 = sphi %s1591_s14, %s1881_s14   ;;  %s1547_s13 = sphi %s1589_s13, %s1880_s13   ;;  %s1543_s12 = sphi %s1587_s12, %s1879_s12  }
   0x5   : > { %s35_s20 = sadd.s32 1, %s1559_s16  ;;  %s126_s21 = sadd.s32 1, %s1551_s14 }
   0x6   : > { %p37_p0 = scmp.ge.s32.totalorder %s35_s20, 8  ;;  %p136_p1 = scmp.ne.s32.totalorder %s1551_s14, %s1547_s13 }
   0x7   : > { %p137_p2 = scmp.eq.s32.totalorder %s1152_s18, 7  ;;  %p142_p3 = scmp.ne.s32.totalorder %s1547_s13, %s1543_s12 }
   0x8   : > { %s1885_s20 = smov (%p37_p0, %s35_s20), 0  ;;  %p143_p5 = scmp.eq.s32.totalorder %s1153_s19, 7 }
   0x9   : > { %p1627_p4 = por %p137_p2, %p136_p1  ;;  %s121_s23 = ssub.s32 %s1559_s16, %s1885_s20 }
   0xa   : > { %p1158_p6 = scmp.ge.s32.totalorder %s1563_s17, 1  ;;  %p124_p7 = scmp.eq.s32.totalorder %s121_s23, 0 }
   0xb   : > { %p1634_p8 = por %p143_p5, %p142_p3  ;;  %p194_p9 = scmp.lt.s32.totalorder %s1563_s17, 9 }
   0xc   : > { %s1640_s25 = scalar_select %p124_p7, %s1551_s14, %s126_s21  }
   0xd   : > { %p195_p10 = pnand %p1158_p6, %p194_p9 }
   0xe   : > { %s1160_s11 = sshll.u32 (!%p195_p10), %s1555_s15, 5  ;;  %s231_s29 = sand.u32 (!%p195_p10), 1, %s1547_s13  }
   0xf   : > { %198 = sbr.rel (%p195_p10) target bundleno = 315 (0x13b), region = 32  ;;  %p236_p11 = scmp.lt.s32.totalorder (!%p195_p10), %s1160_s11, 255 }
  0x10   : > { %s1159_s5 = sshll.u32 (!%p195_p10), %s231_s29, 8  ;;  %s1505_s27 = scalar_lea.hbm (!%p195_p10), %s1876_s3, 2048 }
  0x11   : > { %s1769_s6 = scalar_lea.vmem (!%p195_p10), [#allocation2], %s1159_s5 }
  0x12   : > { %s1038_s18 = sshll.u32 (!%p195_p10), %s1769_s6, 4  ;;  %s1039_s18 = int_to_ptr.vmem [resolvable:$true] %s1038_s18 }
  0x14   : > { %v1400_v0 = vld [vmem:[%s1874_s1 + $0x38] sm:$0xff]  ;;  %v1399_v2 = vld [vmem:[%s1874_s1 + $0x30] sm:$0xff]  ;;  %v1398_v4 = vld [vmem:[%s1874_s1 + $0x28] sm:$0xff]  ;;  %s1887_s11 = smov (!%p236_p11, %s1160_s11), 255 }
  0x15   : > { %v1408_v1 = vld [vmem:[%s1874_s1 + $0x78] sm:$0xff]  ;;  %647 = vmatpush.bf16.msra.mxu0 %v1400_v0  ;;  %1410 = vmatpush.bf16.msra.mxu2 %v1400_v0  ;;  %v1407_v3 = vld [vmem:[%s1874_s1 + $0x70] sm:$0xff]  ;;  %v1406_v5 = vld [vmem:[%s1874_s1 + $0x68] sm:$0xff]  ;;  %s1360_s7 = sshll.u32 %s1887_s11, 3 }
  0x16   : > { %736 = vmatpush.bf16.msra.mxu1 %v1408_v1  ;;  %1418 = vmatpush.bf16.msra.mxu3 %v1408_v1  ;;  %v1397_v6 = vld [vmem:[%s1874_s1 + $0x20] sm:$0xff]  ;;  %v1396_v8 = vld [vmem:[%s1874_s1 + $0x18] sm:$0xff]  ;;  %v1395_v10 = vld [vmem:[%s1874_s1 + $0x10] sm:$0xff]  ;;  %s1685_s19 = scalar_lea.vmem %s1873_s0, %s1360_s7  ;;  %s1409_s7 = sshll.u32 %s1555_s15, 8 }
  0x17   : > { %v1405_v7 = vld [vmem:[%s1874_s1 + $0x60] sm:$0xff]  ;;  %v1404_v9 = vld [vmem:[%s1874_s1 + $0x58] sm:$0xff]  ;;  %v1403_v11 = vld [vmem:[%s1874_s1 + $0x50] sm:$0xff]  ;;  %s1037_s10 = scalar_lea.hbm %s1876_s3, %s1409_s7  ;;  %s1025_s15 = scalar_lea.sflag [#allocation3], %s231_s29 }
  0x18   : > { %v1394_v12 = vld [vmem:[%s1874_s1 + $0x8] sm:$0xff]  ;;  %v1393_v14 = vld [vmem:[%s1874_s1] sm:$0xff]  ;;  %v1173_v28 = vld [vmem:[%s1685_s19 + $0x10] sm:$0xf] }
  0x19   : > { %648 = vmatpush.bf16.msra.mxu0 %v1399_v2  ;;  %1411 = vmatpush.bf16.msra.mxu2 %v1399_v2  ;;  %v1402_v13 = vld [vmem:[%s1874_s1 + $0x48] sm:$0xff]  ;;  %v1401_v15 = vld [vmem:[%s1874_s1 + $0x40] sm:$0xff]  ;;  %v1364_v29 = vld [vmem:[%s1685_s19 + $0x14] sm:$0xf0] }
  0x1a   : > { %737 = vmatpush.bf16.msra.mxu1 %v1407_v3  ;;  %1419 = vmatpush.bf16.msra.mxu3 %v1407_v3  ;;  %v1165_v16 = vld [vmem:[%s1685_s19] sm:$0xf]  ;;  %v1362_v17 = vld [vmem:[%s1685_s19 + $0x4] sm:$0xf0]  ;;  %v1361_v20 = vld [vmem:[%s1685_s19 + $0x4] sm:$0xf]  ;;  %v1174_v36 = vor.u32 %v1364_v29, %v1173_v28 }
  0x1b   : > { %v1229_v18 = vld [vmem:[%s1685_s19 + $0x80] sm:$0xf]  ;;  %v1378_v19 = vld [vmem:[%s1685_s19 + $0x84] sm:$0xf0]  ;;  %v1167_v21 = vld [vmem:[%s1685_s19 + $0x8] sm:$0xf0]  ;;  %v1166_v24 = vor.u32 %v1362_v17, %v1165_v16 }
  0x1c   : > { %v1377_v22 = vld [vmem:[%s1685_s19 + $0x84] sm:$0xf]  ;;  %v1231_v23 = vld [vmem:[%s1685_s19 + $0x88] sm:$0xf0]  ;;  %v1230_v25 = vor.u32 %v1378_v19, %v1229_v18  ;;  %v1170_v26 = vor.u32 %v1361_v20, %v1167_v21  ;;  %v1237_v30 = vld [vmem:[%s1685_s19 + $0x90] sm:$0xf] }
  0x1d   : > { %649 = vmatpush.bf16.msra.mxu0 %v1398_v4  ;;  %1412 = vmatpush.bf16.msra.mxu2 %v1398_v4  ;;  %v1234_v27 = vor.u32 %v1377_v22, %v1231_v23  ;;  %v1380_v31 = vld [vmem:[%s1685_s19 + $0x94] sm:$0xf0]  ;;  %v1363_v32 = vld [vmem:[%s1685_s19 + $0x14] sm:$0xf]  ;;  %v1175_v33 = vld [vmem:[%s1685_s19 + $0x18] sm:$0xf0] }
  0x1e   : > { %738 = vmatpush.bf16.msra.mxu1 %v1406_v5  ;;  %1420 = vmatpush.bf16.msra.mxu3 %v1406_v5  ;;  %v1379_v34 = vld [vmem:[%s1685_s19 + $0x94] sm:$0xf]  ;;  %v1239_v35 = vld [vmem:[%s1685_s19 + $0x98] sm:$0xf0]  ;;  %v1238_v37 = vor.u32 %v1380_v31, %v1237_v30  ;;  %v1178_v38 = vor.u32 %v1363_v32, %v1175_v33  ;;  %v1181_v40 = vld [vmem:[%s1685_s19 + $0x20] sm:$0xf] }
  0x1f   : > { %v1242_v39 = vor.u32 %v1379_v34, %v1239_v35  ;;  %v1366_v41 = vld [vmem:[%s1685_s19 + $0x24] sm:$0xf0]  ;;  %v1245_v42 = vld [vmem:[%s1685_s19 + $0xa0] sm:$0xf]  ;;  %v1365_v44 = vld [vmem:[%s1685_s19 + $0x24] sm:$0xf] }
  0x20   : > { %v1382_v43 = vld [vmem:[%s1685_s19 + $0xa4] sm:$0xf0]  ;;  %v1183_v45 = vld [vmem:[%s1685_s19 + $0x28] sm:$0xf0]  ;;  %v1381_v46 = vld [vmem:[%s1685_s19 + $0xa4] sm:$0xf]  ;;  %v1182_v48 = vor.u32 %v1366_v41, %v1181_v40 }
  0x21   : > { %650 = vmatpush.bf16.msra.mxu0 %v1397_v6  ;;  %1413 = vmatpush.bf16.msra.mxu2 %v1397_v6  ;;  %v1247_v47 = vld [vmem:[%s1685_s19 + $0xa8] sm:$0xf0]  ;;  %v1246_v49 = vor.u32 %v1382_v43, %v1245_v42  ;;  %v1186_v50 = vor.u32 %v1365_v44, %v1183_v45  ;;  %v1189_v52 = vld [vmem:[%s1685_s19 + $0x30] sm:$0xf]  ;;  %v1368_v53 = vld [vmem:[%s1685_s19 + $0x34] sm:$0xf0] }
  0x22   : > { %739 = vmatpush.bf16.msra.mxu1 %v1405_v7  ;;  %1421 = vmatpush.bf16.msra.mxu3 %v1405_v7  ;;  %v1250_v51 = vor.u32 %v1381_v46, %v1247_v47  ;;  %v1253_v54 = vld [vmem:[%s1685_s19 + $0xb0] sm:$0xf]  ;;  %v1384_v55 = vld [vmem:[%s1685_s19 + $0xb4] sm:$0xf0]  ;;  %v1367_v56 = vld [vmem:[%s1685_s19 + $0x34] sm:$0xf]  ;;  %v1190_v60 = vor.u32 %v1368_v53, %v1189_v52 }
  0x23   : > { %v1191_v57 = vld [vmem:[%s1685_s19 + $0x38] sm:$0xf0]  ;;  %v1383_v58 = vld [vmem:[%s1685_s19 + $0xb4] sm:$0xf]  ;;  %v1254_v61 = vor.u32 %v1384_v55, %v1253_v54  ;;  %v1197_v0 = vld [vmem:[%s1685_s19 + $0x40] sm:$0xf] }
  0x24   : > { %v1255_v59 = vld [vmem:[%s1685_s19 + $0xb8] sm:$0xf0]  ;;  %v1194_v62 = vor.u32 %v1367_v56, %v1191_v57  ;;  %v1370_v1 = vld [vmem:[%s1685_s19 + $0x44] sm:$0xf0]  ;;  %v1261_v2 = vld [vmem:[%s1685_s19 + $0xc0] sm:$0xf] }
  0x25   : > { %651 = vmatpush.bf16.msra.mxu0 %v1396_v8  ;;  %1414 = vmatpush.bf16.msra.mxu2 %v1396_v8  ;;  %v1258_v63 = vor.u32 %v1383_v58, %v1255_v59  ;;  %v1386_v3 = vld [vmem:[%s1685_s19 + $0xc4] sm:$0xf0]  ;;  %v1369_v4 = vld [vmem:[%s1685_s19 + $0x44] sm:$0xf]  ;;  %v1199_v5 = vld [vmem:[%s1685_s19 + $0x48] sm:$0xf0]  ;;  %v1198_v8 = vor.u32 %v1370_v1, %v1197_v0 }
  0x26   : > { %740 = vmatpush.bf16.msra.mxu1 %v1404_v9  ;;  %1422 = vmatpush.bf16.msra.mxu3 %v1404_v9  ;;  %v1385_v6 = vld [vmem:[%s1685_s19 + $0xc4] sm:$0xf]  ;;  %v1263_v7 = vld [vmem:[%s1685_s19 + $0xc8] sm:$0xf0]  ;;  %v1262_v9 = vor.u32 %v1386_v3, %v1261_v2  ;;  %v1371_v16 = vld [vmem:[%s1685_s19 + $0x54] sm:$0xf] }
  0x27   : > { %v1207_v17 = vld [vmem:[%s1685_s19 + $0x58] sm:$0xf0]  ;;  %v1387_v18 = vld [vmem:[%s1685_s19 + $0xd4] sm:$0xf]  ;;  %v1373_v28 = vld [vmem:[%s1685_s19 + $0x64] sm:$0xf] }
  0x28   : > { %v1271_v19 = vld [vmem:[%s1685_s19 + $0xd8] sm:$0xf0]  ;;  %v1210_v22 = vor.u32 %v1371_v16, %v1207_v17  ;;  %v1215_v29 = vld [vmem:[%s1685_s19 + $0x68] sm:$0xf0]  ;;  %v1389_v30 = vld [vmem:[%s1685_s19 + $0xe4] sm:$0xf] }
  0x29   : > { %652 = vmatpush.bf16.msra.mxu0 %v1395_v10  ;;  %1415 = vmatpush.bf16.msra.mxu2 %v1395_v10  ;;  %v1202_v10 = vor.u32 %v1369_v4, %v1199_v5  ;;  %v1274_v23 = vor.u32 %v1387_v18, %v1271_v19  ;;  %v1279_v31 = vld [vmem:[%s1685_s19 + $0xe8] sm:$0xf0]  ;;  %v1218_v34 = vor.u32 %v1373_v28, %v1215_v29  ;;  %v1375_v40 = vld [vmem:[%s1685_s19 + $0x74] sm:$0xf]  ;;  %v1223_v41 = vld [vmem:[%s1685_s19 + $0x78] sm:$0xf0] }
  0x2a   : > { %741 = vmatpush.bf16.msra.mxu1 %v1403_v11  ;;  %1423 = vmatpush.bf16.msra.mxu3 %v1403_v11  ;;  %v1266_v11 = vor.u32 %v1385_v6, %v1263_v7  ;;  %v1282_v35 = vor.u32 %v1389_v30, %v1279_v31  ;;  %v1391_v42 = vld [vmem:[%s1685_s19 + $0xf4] sm:$0xf]  ;;  %v1287_v43 = vld [vmem:[%s1685_s19 + $0xf8] sm:$0xf0]  ;;  %v1226_v46 = vor.u32 %v1375_v40, %v1223_v41 }
  0x2b   : > { %v1290_v47 = vor.u32 %v1391_v42, %v1287_v43 }
  0x2d   : > { %653 = vmatpush.bf16.msra.mxu0 %v1394_v12  ;;  %1416 = vmatpush.bf16.msra.mxu2 %v1394_v12  ;;  %v1205_v12 = vld [vmem:[%s1685_s19 + $0x50] sm:$0xf] }
  0x2e   : > { %742 = vmatpush.bf16.msra.mxu1 %v1402_v13  ;;  %1424 = vmatpush.bf16.msra.mxu3 %v1402_v13  ;;  %v1372_v13 = vld [vmem:[%s1685_s19 + $0x54] sm:$0xf0] }
  0x2f   : > { %v1206_v20 = vor.u32 %v1372_v13, %v1205_v12 }
  0x31   : > { %654 = vmatpush.bf16.msra.mxu0 %v1393_v14  ;;  %1417 = vmatpush.bf16.msra.mxu2 %v1393_v14  ;;  %v1269_v14 = vld [vmem:[%s1685_s19 + $0xd0] sm:$0xf] }
  0x32   : > { %743 = vmatpush.bf16.msra.mxu1 %v1401_v15  ;;  %1425 = vmatpush.bf16.msra.mxu3 %v1401_v15  ;;  %v1388_v15 = vld [vmem:[%s1685_s19 + $0xd4] sm:$0xf0] }
  0x33   : > { %v1270_v21 = vor.u32 %v1388_v15, %v1269_v14 }
  0x34   : > { %655 = vmatmul.bf16.vlgmr.msra.gmra.mxu0 %v1166_v24  ;;  %695 = vmatmul.bf16.vlgmr.msra.gmra.mxu2 %v1230_v25  ;;  %v1213_v24 = vld [vmem:[%s1685_s19 + $0x60] sm:$0xf]  ;;  %v1374_v25 = vld [vmem:[%s1685_s19 + $0x64] sm:$0xf0] }
  0x35   : > { %744 = vmatmul.bf16.vlgmr.msra.gmra.mxu1 %v1170_v26  ;;  %784 = vmatmul.bf16.vlgmr.msra.gmra.mxu3 %v1234_v27  ;;  %v1277_v26 = vld [vmem:[%s1685_s19 + $0xe0] sm:$0xf]  ;;  %v1390_v27 = vld [vmem:[%s1685_s19 + $0xe4] sm:$0xf0]  ;;  %v1214_v32 = vor.u32 %v1374_v25, %v1213_v24 }
  0x36   : > { %v1278_v33 = vor.u32 %v1390_v27, %v1277_v26 }
  0x44   : > { %660 = vmatmul.bf16.gmra.mxu0 %v1174_v36  ;;  %700 = vmatmul.bf16.gmra.mxu2 %v1238_v37  ;;  %v1221_v36 = vld [vmem:[%s1685_s19 + $0x70] sm:$0xf]  ;;  %v1376_v37 = vld [vmem:[%s1685_s19 + $0x74] sm:$0xf0] }
  0x45   : > { %749 = vmatmul.bf16.gmra.mxu1 %v1178_v38  ;;  %789 = vmatmul.bf16.gmra.mxu3 %v1242_v39  ;;  %v1285_v38 = vld [vmem:[%s1685_s19 + $0xf0] sm:$0xf]  ;;  %v1392_v39 = vld [vmem:[%s1685_s19 + $0xf4] sm:$0xf0]  ;;  %v1222_v44 = vor.u32 %v1376_v37, %v1221_v36  ;;  %s1040_s19 = sshll.u32 %s1037_s10, 4  ;;  %s1041_s19 = int_to_ptr.hbm [resolvable:$true] %s1040_s19 }
  0x46   : > { %v1286_v45 = vor.u32 %v1392_v39, %v1285_v38  ;;  %s1499_s11 = sshra.s32 %s1041_s19, 4  ;;  %s1500_s11 = int_to_ptr.hbm [resolvable:$true] %s1499_s11 }
  0x47   : > { %s1501_s21 = scalar_lea.hbm %s1500_s11, 256  ;;  %p1506_p1 = scmp.lt.s32.totalorder %s1500_s11, %s1876_s3 }
  0x48   : > { %p1502_p12 = scmp.ne.s32.totalorder %s1500_s11, %s1501_s21  ;;  %p1507_p2 = scmp.lt.s32.totalorder %s1505_s27, %s1501_s21 }
  0x4a   : > { %p1503_p13 = pnand %p1502_p12, %p1627_p4  ;;  %p1508_p3 = por %p1507_p2, %p1506_p1 }
  0x4c   : > { %p1504_p0 = pneg %p1503_p13 }
  0x4e   : > { %p1509_p5 = pnand %p1508_p3, %p1504_p0 }
  0x54   : > { %665 = vmatmul.bf16.gmra.mxu0 %v1182_v48  ;;  %705 = vmatmul.bf16.gmra.mxu2 %v1246_v49 }
  0x55   : > { %754 = vmatmul.bf16.gmra.mxu1 %v1186_v50  ;;  %794 = vmatmul.bf16.gmra.mxu3 %v1250_v51  ;;  %v1764_v51 = vld [vmem:[%s1875_s2] ss:$0 sm:$0xff] }
  0x64   : > { %670 = vmatmul.bf16.gmra.mxu0 %v1190_v60  ;;  %710 = vmatmul.bf16.gmra.mxu2 %v1254_v61 }
  0x65   : > { %759 = vmatmul.bf16.gmra.mxu1 %v1194_v62  ;;  %799 = vmatmul.bf16.gmra.mxu3 %v1258_v63 }
  0x74   : > { %675 = vmatmul.bf16.gmra.mxu0 %v1198_v8  ;;  %715 = vmatmul.bf16.gmra.mxu2 %v1262_v9 }
  0x75   : > { %764 = vmatmul.bf16.gmra.mxu1 %v1202_v10  ;;  %804 = vmatmul.bf16.gmra.mxu3 %v1266_v11 }
  0x84   : > { %680 = vmatmul.bf16.gmra.mxu0 %v1206_v20  ;;  %720 = vmatmul.bf16.gmra.mxu2 %v1270_v21 }
  0x85   : > { %769 = vmatmul.bf16.gmra.mxu1 %v1210_v22  ;;  %809 = vmatmul.bf16.gmra.mxu3 %v1274_v23 }
  0x94   : > { %685 = vmatmul.bf16.gmra.mxu0 %v1214_v32  ;;  %725 = vmatmul.bf16.gmra.mxu2 %v1278_v33 }
  0x95   : > { %774 = vmatmul.bf16.gmra.mxu1 %v1218_v34  ;;  %814 = vmatmul.bf16.gmra.mxu3 %v1282_v35 }
  0xa4   : > { %690 = vmatmul.bf16.gmra.mxu0 %v1222_v44  ;;  %730 = vmatmul.bf16.gmra.mxu2 %v1286_v45 }
  0xa5   : > { %779 = vmatmul.bf16.gmra.mxu1 %v1226_v46  ;;  %819 = vmatmul.bf16.gmra.mxu3 %v1290_v47 }
  0xb1   : > { %v656_v48 = vpop.f32.mrf.mxu0 }
  0xb2   : > { %v745_v49 = vpop.f32.mrf.mxu1 }
  0xb3   : > { %v746_v50 = vadd.f32 %v745_v49, %v656_v48 }
  0xb5   : > { %v928_v52 = vadd.f32 %v1764_v51, %v746_v50 }
  0xb7   : > { %v696_v53 = vpop.f32.mrf.mxu2  ;;  %v960_v55 = vmax.f32 %v928_v52, 0.0 }
  0xb8   : > { %v785_v54 = vpop.f32.mrf.mxu3 }
  0xb9   : > { %v786_v56 = vadd.f32 %v785_v54, %v696_v53  ;;  %v658_v57 = vpop.f32.mrf.mxu0  ;;  %992 = vst [vmem:[%s1769_s6] sm:$0xff] %v960_v55 }
  0xba   : > { %v747_v58 = vpop.f32.mrf.mxu1 }
  0xbb   : > { %v748_v59 = vadd.f32 %v747_v58, %v658_v57  ;;  %v944_v60 = vadd.f32 %v1764_v51, %v786_v56 }
  0xbd   : > { %v976_v61 = vmax.f32 %v944_v60, 0.0  ;;  %v929_v62 = vadd.f32 %v1764_v51, %v748_v59 }
  0xbf   : > { %v698_v63 = vpop.f32.mrf.mxu2  ;;  %1008 = vst [vmem:[%s1769_s6 + $0x80] sm:$0xff] %v976_v61  ;;  %v961_v1 = vmax.f32 %v929_v62, 0.0 }
  0xc0   : > { %v787_v0 = vpop.f32.mrf.mxu3 }
  0xc1   : > { %v788_v2 = vadd.f32 %v787_v0, %v698_v63  ;;  %v661_v3 = vpop.f32.mrf.mxu0  ;;  %993 = vst [vmem:[%s1769_s6 + $0x8] sm:$0xff] %v961_v1 }
  0xc2   : > { %v750_v4 = vpop.f32.mrf.mxu1 }
  0xc3   : > { %v751_v5 = vadd.f32 %v750_v4, %v661_v3  ;;  %v945_v6 = vadd.f32 %v1764_v51, %v788_v2 }
  0xc5   : > { %v977_v7 = vmax.f32 %v945_v6, 0.0  ;;  %v930_v8 = vadd.f32 %v1764_v51, %v751_v5 }
  0xc7   : > { %v701_v9 = vpop.f32.mrf.mxu2  ;;  %1009 = vst [vmem:[%s1769_s6 + $0x88] sm:$0xff] %v977_v7  ;;  %v962_v11 = vmax.f32 %v930_v8, 0.0 }
  0xc8   : > { %v790_v10 = vpop.f32.mrf.mxu3 }
  0xc9   : > { %v791_v12 = vadd.f32 %v790_v10, %v701_v9  ;;  %v663_v13 = vpop.f32.mrf.mxu0  ;;  %994 = vst [vmem:[%s1769_s6 + $0x10] sm:$0xff] %v962_v11 }
  0xca   : > { %v752_v14 = vpop.f32.mrf.mxu1 }
  0xcb   : > { %v753_v15 = vadd.f32 %v752_v14, %v663_v13  ;;  %v946_v16 = vadd.f32 %v1764_v51, %v791_v12 }
  0xcd   : > { %v978_v17 = vmax.f32 %v946_v16, 0.0  ;;  %v931_v18 = vadd.f32 %v1764_v51, %v753_v15 }
  0xcf   : > { %v703_v19 = vpop.f32.mrf.mxu2  ;;  %1010 = vst [vmem:[%s1769_s6 + $0x90] sm:$0xff] %v978_v17  ;;  %v963_v21 = vmax.f32 %v931_v18, 0.0 }
  0xd0   : > { %v792_v20 = vpop.f32.mrf.mxu3 }
  0xd1   : > { %v793_v22 = vadd.f32 %v792_v20, %v703_v19  ;;  %v666_v23 = vpop.f32.mrf.mxu0  ;;  %995 = vst [vmem:[%s1769_s6 + $0x18] sm:$0xff] %v963_v21 }
  0xd2   : > { %v755_v24 = vpop.f32.mrf.mxu1 }
  0xd3   : > { %v756_v25 = vadd.f32 %v755_v24, %v666_v23  ;;  %v947_v26 = vadd.f32 %v1764_v51, %v793_v22 }
  0xd5   : > { %v979_v27 = vmax.f32 %v947_v26, 0.0  ;;  %v932_v28 = vadd.f32 %v1764_v51, %v756_v25 }
  0xd7   : > { %v706_v29 = vpop.f32.mrf.mxu2  ;;  %1011 = vst [vmem:[%s1769_s6 + $0x98] sm:$0xff] %v979_v27  ;;  %v964_v31 = vmax.f32 %v932_v28, 0.0 }
  0xd8   : > { %v795_v30 = vpop.f32.mrf.mxu3 }
  0xd9   : > { %v796_v32 = vadd.f32 %v795_v30, %v706_v29  ;;  %v668_v33 = vpop.f32.mrf.mxu0  ;;  %996 = vst [vmem:[%s1769_s6 + $0x20] sm:$0xff] %v964_v31 }
  0xda   : > { %v757_v34 = vpop.f32.mrf.mxu1 }
  0xdb   : > { %v758_v35 = vadd.f32 %v757_v34, %v668_v33  ;;  %v948_v36 = vadd.f32 %v1764_v51, %v796_v32 }
  0xdd   : > { %v980_v37 = vmax.f32 %v948_v36, 0.0  ;;  %v933_v38 = vadd.f32 %v1764_v51, %v758_v35 }
  0xdf   : > { %v708_v39 = vpop.f32.mrf.mxu2  ;;  %1012 = vst [vmem:[%s1769_s6 + $0xa0] sm:$0xff] %v980_v37  ;;  %v965_v41 = vmax.f32 %v933_v38, 0.0 }
  0xe0   : > { %v797_v40 = vpop.f32.mrf.mxu3 }
  0xe1   : > { %v798_v42 = vadd.f32 %v797_v40, %v708_v39  ;;  %v671_v43 = vpop.f32.mrf.mxu0  ;;  %997 = vst [vmem:[%s1769_s6 + $0x28] sm:$0xff] %v965_v41 }
  0xe2   : > { %v760_v44 = vpop.f32.mrf.mxu1 }
  0xe3   : > { %v761_v45 = vadd.f32 %v760_v44, %v671_v43  ;;  %v949_v46 = vadd.f32 %v1764_v51, %v798_v42 }
  0xe5   : > { %v981_v47 = vmax.f32 %v949_v46, 0.0  ;;  %v934_v48 = vadd.f32 %v1764_v51, %v761_v45 }
  0xe7   : > { %v711_v49 = vpop.f32.mrf.mxu2  ;;  %1013 = vst [vmem:[%s1769_s6 + $0xa8] sm:$0xff] %v981_v47  ;;  %v966_v52 = vmax.f32 %v934_v48, 0.0 }
  0xe8   : > { %v800_v50 = vpop.f32.mrf.mxu3 }
  0xe9   : > { %v801_v53 = vadd.f32 %v800_v50, %v711_v49  ;;  %v673_v54 = vpop.f32.mrf.mxu0  ;;  %998 = vst [vmem:[%s1769_s6 + $0x30] sm:$0xff] %v966_v52 }
  0xea   : > { %v762_v55 = vpop.f32.mrf.mxu1 }
  0xeb   : > { %v763_v56 = vadd.f32 %v762_v55, %v673_v54  ;;  %v950_v57 = vadd.f32 %v1764_v51, %v801_v53 }
  0xed   : > { %v982_v58 = vmax.f32 %v950_v57, 0.0  ;;  %v935_v59 = vadd.f32 %v1764_v51, %v763_v56 }
  0xef   : > { %v713_v60 = vpop.f32.mrf.mxu2  ;;  %1014 = vst [vmem:[%s1769_s6 + $0xb0] sm:$0xff] %v982_v58  ;;  %v967_v62 = vmax.f32 %v935_v59, 0.0 }
  0xf0   : > { %v802_v61 = vpop.f32.mrf.mxu3 }
  0xf1   : > { %v803_v63 = vadd.f32 %v802_v61, %v713_v60  ;;  %v676_v0 = vpop.f32.mrf.mxu0  ;;  %999 = vst [vmem:[%s1769_s6 + $0x38] sm:$0xff] %v967_v62 }
  0xf2   : > { %v765_v1 = vpop.f32.mrf.mxu1 }
  0xf3   : > { %v766_v2 = vadd.f32 %v765_v1, %v676_v0  ;;  %v951_v3 = vadd.f32 %v1764_v51, %v803_v63 }
  0xf5   : > { %v983_v4 = vmax.f32 %v951_v3, 0.0  ;;  %v936_v5 = vadd.f32 %v1764_v51, %v766_v2 }
  0xf7   : > { %v716_v6 = vpop.f32.mrf.mxu2  ;;  %1015 = vst [vmem:[%s1769_s6 + $0xb8] sm:$0xff] %v983_v4  ;;  %v968_v8 = vmax.f32 %v936_v5, 0.0 }
  0xf8   : > { %v805_v7 = vpop.f32.mrf.mxu3 }
  0xf9   : > { %v806_v9 = vadd.f32 %v805_v7, %v716_v6  ;;  %v678_v10 = vpop.f32.mrf.mxu0  ;;  %1000 = vst [vmem:[%s1769_s6 + $0x40] sm:$0xff] %v968_v8 }
  0xfa   : > { %v767_v11 = vpop.f32.mrf.mxu1 }
  0xfb   : > { %v768_v12 = vadd.f32 %v767_v11, %v678_v10  ;;  %v952_v13 = vadd.f32 %v1764_v51, %v806_v9 }
  0xfd   : > { %v984_v14 = vmax.f32 %v952_v13, 0.0  ;;  %v937_v15 = vadd.f32 %v1764_v51, %v768_v12 }
  0xff   : > { %v718_v16 = vpop.f32.mrf.mxu2  ;;  %1016 = vst [vmem:[%s1769_s6 + $0xc0] sm:$0xff] %v984_v14  ;;  %v969_v18 = vmax.f32 %v937_v15, 0.0 }
 0x100   : > { %v807_v17 = vpop.f32.mrf.mxu3 }
 0x101   : > { %v808_v19 = vadd.f32 %v807_v17, %v718_v16  ;;  %v681_v20 = vpop.f32.mrf.mxu0  ;;  %1001 = vst [vmem:[%s1769_s6 + $0x48] sm:$0xff] %v969_v18 }
 0x102   : > { %v770_v21 = vpop.f32.mrf.mxu1 }
 0x103   : > { %v771_v22 = vadd.f32 %v770_v21, %v681_v20  ;;  %v953_v23 = vadd.f32 %v1764_v51, %v808_v19 }
 0x105   : > { %v985_v24 = vmax.f32 %v953_v23, 0.0  ;;  %v938_v25 = vadd.f32 %v1764_v51, %v771_v22 }
 0x107   : > { %v721_v26 = vpop.f32.mrf.mxu2  ;;  %1017 = vst [vmem:[%s1769_s6 + $0xc8] sm:$0xff] %v985_v24  ;;  %v970_v28 = vmax.f32 %v938_v25, 0.0 }
 0x108   : > { %v810_v27 = vpop.f32.mrf.mxu3 }
 0x109   : > { %v811_v29 = vadd.f32 %v810_v27, %v721_v26  ;;  %v683_v30 = vpop.f32.mrf.mxu0  ;;  %1002 = vst [vmem:[%s1769_s6 + $0x50] sm:$0xff] %v970_v28 }
 0x10a   : > { %v772_v31 = vpop.f32.mrf.mxu1 }
 0x10b   : > { %v773_v32 = vadd.f32 %v772_v31, %v683_v30  ;;  %v954_v33 = vadd.f32 %v1764_v51, %v811_v29 }
 0x10d   : > { %v986_v34 = vmax.f32 %v954_v33, 0.0  ;;  %v939_v35 = vadd.f32 %v1764_v51, %v773_v32 }
 0x10f   : > { %v723_v36 = vpop.f32.mrf.mxu2  ;;  %1018 = vst [vmem:[%s1769_s6 + $0xd0] sm:$0xff] %v986_v34  ;;  %v971_v38 = vmax.f32 %v939_v35, 0.0 }
 0x110   : > { %v812_v37 = vpop.f32.mrf.mxu3 }
 0x111   : > { %v813_v39 = vadd.f32 %v812_v37, %v723_v36  ;;  %v686_v40 = vpop.f32.mrf.mxu0  ;;  %1003 = vst [vmem:[%s1769_s6 + $0x58] sm:$0xff] %v971_v38 }
 0x112   : > { %v775_v41 = vpop.f32.mrf.mxu1 }
 0x113   : > { %v776_v42 = vadd.f32 %v775_v41, %v686_v40  ;;  %v955_v43 = vadd.f32 %v1764_v51, %v813_v39 }
 0x115   : > { %v987_v44 = vmax.f32 %v955_v43, 0.0  ;;  %v940_v45 = vadd.f32 %v1764_v51, %v776_v42 }
 0x117   : > { %v726_v46 = vpop.f32.mrf.mxu2  ;;  %1019 = vst [vmem:[%s1769_s6 + $0xd8] sm:$0xff] %v987_v44  ;;  %v972_v48 = vmax.f32 %v940_v45, 0.0 }
 0x118   : > { %v815_v47 = vpop.f32.mrf.mxu3 }
 0x119   : > { %v816_v49 = vadd.f32 %v815_v47, %v726_v46  ;;  %v688_v50 = vpop.f32.mrf.mxu0  ;;  %1004 = vst [vmem:[%s1769_s6 + $0x60] sm:$0xff] %v972_v48 }
 0x11a   : > { %v777_v52 = vpop.f32.mrf.mxu1 }
 0x11b   : > { %v778_v53 = vadd.f32 %v777_v52, %v688_v50  ;;  %v956_v54 = vadd.f32 %v1764_v51, %v816_v49 }
 0x11d   : > { %v988_v55 = vmax.f32 %v956_v54, 0.0  ;;  %v941_v56 = vadd.f32 %v1764_v51, %v778_v53 }
 0x11f   : > { %v728_v57 = vpop.f32.mrf.mxu2  ;;  %1020 = vst [vmem:[%s1769_s6 + $0xe0] sm:$0xff] %v988_v55  ;;  %v973_v59 = vmax.f32 %v941_v56, 0.0 }
 0x120   : > { %v817_v58 = vpop.f32.mrf.mxu3 }
 0x121   : > { %v818_v60 = vadd.f32 %v817_v58, %v728_v57  ;;  %v691_v61 = vpop.f32.mrf.mxu0  ;;  %1005 = vst [vmem:[%s1769_s6 + $0x68] sm:$0xff] %v973_v59 }
 0x122   : > { %v780_v62 = vpop.f32.mrf.mxu1 }
 0x123   : > { %v781_v63 = vadd.f32 %v780_v62, %v691_v61  ;;  %v957_v0 = vadd.f32 %v1764_v51, %v818_v60 }
 0x125   : > { %v989_v1 = vmax.f32 %v957_v0, 0.0  ;;  %v942_v2 = vadd.f32 %v1764_v51, %v781_v63 }
 0x127   : > { %v731_v3 = vpop.f32.mrf.mxu2  ;;  %1021 = vst [vmem:[%s1769_s6 + $0xe8] sm:$0xff] %v989_v1  ;;  %v974_v5 = vmax.f32 %v942_v2, 0.0 }
 0x128   : > { %v820_v4 = vpop.f32.mrf.mxu3 }
 0x129   : > { %v821_v6 = vadd.f32 %v820_v4, %v731_v3  ;;  %v693_v7 = vpop.f32.mrf.mxu0  ;;  %1006 = vst [vmem:[%s1769_s6 + $0x70] sm:$0xff] %v974_v5 }
 0x12a   : > { %v782_v8 = vpop.f32.mrf.mxu1 }
 0x12b   : > { %v783_v9 = vadd.f32 %v782_v8, %v693_v7  ;;  %v958_v10 = vadd.f32 %v1764_v51, %v821_v6 }
 0x12d   : > { %v990_v11 = vmax.f32 %v958_v10, 0.0  ;;  %v943_v12 = vadd.f32 %v1764_v51, %v783_v9 }
 0x12f   : > { %v733_v13 = vpop.f32.mrf.mxu2  ;;  %1022 = vst [vmem:[%s1769_s6 + $0xf0] sm:$0xff] %v990_v11  ;;  %v975_v15 = vmax.f32 %v943_v12, 0.0 }
 0x130   : > { %v822_v14 = vpop.f32.mrf.mxu3 }
 0x131   : > { %v823_v16 = vadd.f32 %v822_v14, %v733_v13  ;;  %1007 = vst [vmem:[%s1769_s6 + $0x78] sm:$0xff] %v975_v15 }
 0x133   : > { %v959_v17 = vadd.f32 %v1764_v51, %v823_v16 }
 0x135   : > { %v991_v18 = vmax.f32 %v959_v17, 0.0 }
 0x137   : > { %1023 = vst [vmem:[%s1769_s6 + $0xf8] sm:$0xff] %v991_v18 }
 0x138   : > { %1512 = shalt.err (!%p1509_p5)
}
 0x139   : > { %s1565_s29 = smov 128   ;;  %s1566_s4 = smov 8  }
 0x13a   : > { %1426 = dma.vmem_to_hbm [thread:$0]  (%p1627_p4), %s1039_s18, 4096, %s1041_s19, %s1025_s15, %s1565_s29, %s1565_s29, %s1566_s4  }
 0x13b PF: > { %p1432_p6 = scmp.ge.s32.totalorder %s1563_s17, 2  ;;  %s1055_s5 = sand.u32 1, %s1543_s12  }
 0x13c   : > { %s1056_s6 = scalar_lea.sflag [#allocation3], %s1055_s5 }
 0x13d   : > { %p1429_p7 = pnand %p1432_p6, %p1634_p8 }
 0x13f   : > { %p1430_p9 = pneg %p1429_p7 }
 0x141   : > { %1538 = dma.done.wait (%p1430_p9), %s1056_s6, 4096  }
 0x142   : > { %1540 = vsyncadd (%p1430_p9), %s1056_s6, 4294963200  ;;  %s16_s17 = sadd.s32 1, %s1563_s17   ;;  %s1879_s12 = smov %s1547_s13 }
 0x143   : > { %p13_p10 = scmp.ge.s32.totalorder %s16_s17, 10   ;;  %s1880_s13 = smov %s1551_s14 }
 0x144   : > { %s1881_s14 = smov %s1640_s25  ;;  %s1882_s15 = smov %s1559_s16 }
 0x145   : > { %s1883_s16 = smov %s1885_s20  ;;  %15 = sbr.rel (!%p13_p10) target bundleno = 4 (0x4), region = 81 }
 0x14a   :  { %1062 = vsyncpa [#allocation3], 1 }
 0x14b   :  { %1064 = vsyncpa [#allocation3 + $0x1], 1 }

</bundles_post_ra>
